<compile_context>
chip_gen: v7x
topology: tpu7x:2x2x1
jax: 0.10.0
libtpu: 0.0.40
codegen_flags: <defaults>
</compile_context>

<pallas_src>
from functools import partial

import jax
import jax.numpy as jnp
from jax.experimental import pallas as pl
from jax.experimental.pallas import tpu as pltpu


def _round_up(x, m):
    return ((x + m - 1) // m) * m


# ----------------------------------------------------------------------------
# Kernel: full MLP forward for the selected subnet + fused action gather.
# Refs: (time_smem, x, w_slab, b_slab, act_idx, preds_out, q_out)
# ----------------------------------------------------------------------------
def _make_kernel(in0_pad, width, num_layers):
    def kernel(t_ref, x_ref, w_ref, b_ref, act_ref, preds_ref, q_ref):
        del t_ref  # only used by the index_maps to pick the subnet slab

        h = x_ref[...]                      # bf16 [B_TILE, in0_pad]
        b_all = b_ref[...]                  # f32  [L, width]  (preloaded once)

        row = 0
        for i in range(num_layers):
            k = in0_pad if i == 0 else width
            # Static, 128-row-aligned slice of the packed weight slab (free).
            w = w_ref[row:row + k, :]       # bf16 [k, width]
            z = jnp.dot(h, w, preferred_element_type=jnp.float32) + b_all[i]
            if i < num_layers - 1:
                # bf16 activations between layers (native VPU bf16 on v6e/v7x;
                # on v5e this is just a pack, the math above stays f32).
                h = jnp.maximum(z, 0.0).astype(jnp.bfloat16)
            else:
                h = z                       # f32 final predictions
            row += k

        preds_ref[...] = h                  # lane-dense [B_TILE, width] f32

        # Fused torch.gather(preds, 1, act_idx): iota==idx mask + lane reduce.
        idx = act_ref[...]                  # [B_TILE, 1] int32
        lanes = jax.lax.broadcasted_iota(jnp.int32, h.shape, 1)
        q_ref[...] = jnp.sum(jnp.where(lanes == idx, h, 0.0),
                             axis=1, keepdims=True)

    return kernel


# ----------------------------------------------------------------------------
# Jitted fused forward: one pallas_call for both subnets / both output modes.
# ----------------------------------------------------------------------------
@partial(jax.jit,
         static_argnames=("in0_pad", "width", "num_layers", "n_actions", "b_tile"))
def _nstep_forward(time_t, x, act_idx, w_slabs, b_slabs, *,
                   in0_pad, width, num_layers, n_actions, b_tile):
    batch = x.shape[0]
    padded_b = _round_up(batch, b_tile)
    w_rows = in0_pad + width * (num_layers - 1)

    # Lane- and batch-pad x, cast to bf16 (halves the x DMA; unmasked loads).
    x = jnp.pad(x, ((0, padded_b - batch), (0, in0_pad - x.shape[1])))
    x = x.astype(jnp.bfloat16)
    act_idx = jnp.pad(act_idx, ((0, padded_b - batch), (0, 0)))

    kernel = _make_kernel(in0_pad, width, num_layers)
    grid = (padded_b // b_tile,)

    preds, q = pl.pallas_call(
        kernel,
        out_shape=(jax.ShapeDtypeStruct((padded_b, width), jnp.float32),
                   jax.ShapeDtypeStruct((padded_b, 1), jnp.float32)),
        grid_spec=pltpu.PrefetchScalarGridSpec(
            num_scalar_prefetch=1,          # time_t lands in SMEM
            grid=grid,
            in_specs=[
                # x: tiled over batch
                pl.BlockSpec((b_tile, in0_pad), lambda i, t: (i, 0)),
                # weight slab: subnet selected by time_t, VMEM-resident over grid
                pl.BlockSpec((None, w_rows, width), lambda i, t: (t[0], 0, 0)),
                # bias slab: same
                pl.BlockSpec((None, num_layers, width), lambda i, t: (t[0], 0, 0)),
                # action indices: tiled over batch
                pl.BlockSpec((b_tile, 1), lambda i, t: (i, 0)),
            ],
            out_specs=[
                pl.BlockSpec((b_tile, width), lambda i, t: (i, 0)),
                pl.BlockSpec((b_tile, 1), lambda i, t: (i, 0)),
            ],
        ),
        compiler_params=pltpu.CompilerParams(
            dimension_semantics=("parallel",)),   # v7x: shard batch over 2 TCs
    )(time_t, x, w_slabs, b_slabs, act_idx)

    return preds[:batch, :n_actions], q[:batch]


# ----------------------------------------------------------------------------
# Parameter construction (mirrors QNet.build_mlp_layers / init_weights)
# ----------------------------------------------------------------------------
def _mlp_layer_sizes(input_size, first_hidden_size, layer_min_size=16):
    dims = []
    layer_in, layer_out = input_size, first_hidden_size
    while True:
        dims.append((layer_in, layer_out))
        layer_in = layer_out
        layer_out = int(layer_out / 2)
        if layer_out <= layer_min_size:
            break
    return dims, layer_in  # hidden (in, out) pairs, output-layer input size


def _init_linear(key, fan_in, fan_out):
    # kaiming_uniform_ (a=0): bound = sqrt(6 / fan_in); bias: torch Linear default.
    kw, kb = jax.random.split(key)
    bound_w = (6.0 / fan_in) ** 0.5
    w = jax.random.uniform(kw, (fan_in, fan_out), jnp.float32, -bound_w, bound_w)
    bound_b = 1.0 / (fan_in ** 0.5)
    b = jax.random.uniform(kb, (fan_out,), jnp.float32, -bound_b, bound_b)
    return w, b


def build_nstep_slabs(key, input_size, first_hidden_size, n_actions_list):
    """Pack BOTH subnets' weights/biases into stacked, tile-aligned slabs."""
    hidden_dims, last_hidden = _mlp_layer_sizes(input_size, first_hidden_size)
    num_layers = len(hidden_dims) + 1
    max_out = max(max(o for _, o in hidden_dims), max(n_actions_list))

    width = _round_up(max_out, 128)          # lane-dense layer width
    in0_pad = _round_up(input_size, 128)     # lane-aligned first-layer K
    w_rows = in0_pad + width * (num_layers - 1)
    n_sub = len(n_actions_list)

    w_slabs = jnp.zeros((n_sub, w_rows, width), jnp.float32)
    b_slabs = jnp.zeros((n_sub, num_layers, width), jnp.float32)

    for s, n_act in enumerate(n_actions_list):
        dims = hidden_dims + [(last_hidden, n_act)]
        row = 0
        for i, (fi, fo) in enumerate(dims):
            key, sub = jax.random.split(key)
            w, b = _init_linear(sub, fi, fo)
            w_slabs = w_slabs.at[s, row:row + fi, :fo].set(w)  # stored [in, out]
            b_slabs = b_slabs.at[s, i, :fo].set(b)
            row += in0_pad if i == 0 else width

    w_slabs = w_slabs.astype(jnp.bfloat16)   # MXU-native inputs; f32 accumulate
    meta = dict(in0_pad=in0_pad, width=width, num_layers=num_layers,
                input_size=input_size, n_actions=tuple(n_actions_list))
    return w_slabs, b_slabs, meta


class NStepQNetPallas:
    """Pallas equivalent of NStepQNet (MLP arch): two QNet sub-networks fused."""

    def __init__(self, key, input_size, first_hidden_size,
                 num_destroy_ops, num_repair_ops):
        self.w_slabs, self.b_slabs, self.meta = build_nstep_slabs(
            key, input_size, first_hidden_size,
            [num_destroy_ops, num_repair_ops])
        self.num_steps = 2

    def forward(self, time_t, x, for_actions=None):
        assert 0 <= time_t < self.num_steps
        batch = x.shape[0]
        b_tile = min(128, _round_up(batch, 16))   # bf16 sublane-aligned batch tile

        if for_actions is None:
            act_idx = jnp.zeros((batch, 1), jnp.int32)
        else:
            # for_actions are action encodings; accept a list or a device array.
            act_idx = jnp.asarray(for_actions, jnp.int32).reshape(batch, 1)

        t_arr = jnp.asarray([time_t], jnp.int32)
        preds, q = _nstep_forward(
            t_arr, x, act_idx, self.w_slabs, self.b_slabs,
            in0_pad=self.meta["in0_pad"], width=self.meta["width"],
            num_layers=self.meta["num_layers"],
            n_actions=self.meta["n_actions"][time_t], b_tile=b_tile)
        return q if for_actions is not None else preds


# ----------------------------------------------------------------------------
# Plain-JAX reference on the same packed/quantized params (sanity check)
# ----------------------------------------------------------------------------
def _ref_forward(x, w_slab, b_slab, meta, n_actions):
    in0_pad, width, num_layers = meta["in0_pad"], meta["width"], meta["num_layers"]
    h = jnp.pad(x, ((0, 0), (0, in0_pad - x.shape[1]))).astype(jnp.bfloat16)
    row = 0
    for i in range(num_layers):
        k = in0_pad if i == 0 else width
        w = w_slab[row:row + k].astype(jnp.float32)
        z = h.astype(jnp.float32) @ w + b_slab[i]
        if i < num_layers - 1:
            h = jnp.maximum(z, 0.0).astype(jnp.bfloat16)
        else:
            h = z
        row += k
    return h[:, :n_actions]


if __name__ == "__main__":
    key = jax.random.PRNGKey(0)
    k_net, k_x = jax.random.split(key)

    # Small deterministic problem: batch=8 states, mlp input size 64,
    # first_hidden_size 64 -> hidden layers [64->64, 64->32],
    # 4 destroy operators / 5 repair operators.
    batch = 8
    input_size = 64
    first_hidden_size = 64
    num_destroy_ops = 4
    num_repair_ops = 5

    net = NStepQNetPallas(k_net, input_size, first_hidden_size,
                          num_destroy_ops, num_repair_ops)

    x = jax.random.normal(k_x, (batch, input_size), dtype=jnp.float32)

    # time_t = 0 (destroy subnet): full predictions.
    preds0 = jax.block_until_ready(net.forward(0, x))

    # time_t = 1 (repair subnet): gathered q-values, fused inside the kernel.
    for_actions = jnp.asarray([0, 1, 2, 3, 4, 0, 1, 2], jnp.int32)
    qvals1 = jax.block_until_ready(net.forward(1, x, for_actions=for_actions))

    # Sanity check against a plain-JAX reference using the same packed params.
    ref0 = _ref_forward(x, net.w_slabs[0], net.b_slabs[0], net.meta, num_destroy_ops)
    ref1 = _ref_forward(x, net.w_slabs[1], net.b_slabs[1], net.meta, num_repair_ops)
    ref_q1 = jnp.take_along_axis(ref1, for_actions[:, None], axis=1)

    assert preds0.shape == (batch, num_destroy_ops)
    assert qvals1.shape == (batch, 1)
    assert jnp.allclose(preds0, ref0, atol=2e-2, rtol=2e-2)
    assert jnp.allclose(qvals1, ref_q1, atol=2e-2, rtol=2e-2)

    print("KERNEL_OK")
</pallas_src>

<mosaic_0001>
module attributes {stable_mosaic.version = 11 : i64} {
  func.func @kernel(%arg0: i32, %arg1: memref<1xi32, #tpu.memory_space<smem>>, %arg2: memref<16x128xbf16, #tpu.memory_space<vmem>>, %arg3: memref<1x384x128xbf16, #tpu.memory_space<vmem>>, %arg4: memref<1x3x128xf32, #tpu.memory_space<vmem>>, %arg5: memref<16x1xi32, #tpu.memory_space<vmem>>, %arg6: memref<16x128xf32, #tpu.memory_space<vmem>>, %arg7: memref<16x1xf32, #tpu.memory_space<vmem>>) attributes {dimension_semantics = [#tpu.dimension_semantics<parallel>], iteration_bounds = array<i64: 1>, scalar_prefetch = 1 : i64, scratch_operands = 0 : i64, tpu.core_type = #tpu.core_type<tc>, window_params = [{transform_indices = @transform_0, window_bounds = array<i64: 16, 128>}, {transform_indices = @transform_1, window_bounds = array<i64: 1, 384, 128>}, {transform_indices = @transform_2, window_bounds = array<i64: 1, 3, 128>}, {transform_indices = @transform_3, window_bounds = array<i64: 16, 1>}, {transform_indices = @transform_4, window_bounds = array<i64: 16, 128>}, {transform_indices = @transform_5, window_bounds = array<i64: 16, 1>}]} {
    %c0 = arith.constant 0 : index
    %c0_0 = arith.constant 0 : index
    %0 = vector.load %arg2[%c0, %c0_0] : memref<16x128xbf16, #tpu.memory_space<vmem>>, vector<16x128xbf16>
    %c0_1 = arith.constant 0 : index
    %c0_2 = arith.constant 0 : index
    %c0_3 = arith.constant 0 : index
    %1 = vector.load %arg4[%c0_1, %c0_2, %c0_3] : memref<1x3x128xf32, #tpu.memory_space<vmem>>, vector<1x3x128xf32>
    %2 = vector.shape_cast %1 : vector<1x3x128xf32> to vector<3x128xf32>
    %c0_4 = arith.constant 0 : index
    %c0_5 = arith.constant 0 : index
    %c0_6 = arith.constant 0 : index
    %3 = vector.load %arg3[%c0_4, %c0_5, %c0_6] : memref<1x384x128xbf16, #tpu.memory_space<vmem>>, vector<1x128x128xbf16>
    %4 = vector.shape_cast %3 : vector<1x128x128xbf16> to vector<128x128xbf16>
    %cst = arith.constant dense<0.000000e+00> : vector<16x128xf32>
    %5 = tpu.matmul %0, %4, %cst {dimension_numbers = #tpu.dot_dimension_numbers<[1], [0], [0], [1], [0, 0, 1, 1], [], []>} : vector<16x128xbf16>, vector<128x128xbf16>, vector<16x128xf32> -> vector<16x128xf32>
    %6 = vector.extract_strided_slice %2 {offsets = [0, 0], sizes = [1, 128], strides = [1, 1]} : vector<3x128xf32> to vector<1x128xf32>
    %7 = vector.shape_cast %6 : vector<1x128xf32> to vector<128xf32>
    %8 = vector.shape_cast %7 : vector<128xf32> to vector<1x128xf32>
    %9 = vector.broadcast %8 : vector<1x128xf32> to vector<16x128xf32>
    %10 = arith.addf %5, %9 : vector<16x128xf32>
    %cst_7 = arith.constant 0.000000e+00 : f32
    %11 = vector.broadcast %cst_7 : f32 to vector<16x128xf32>
    %12 = arith.maximumf %10, %11 : vector<16x128xf32>
    %13 = arith.truncf %12 : vector<16x128xf32> to vector<16x128xbf16>
    %c0_8 = arith.constant 0 : index
    %c128 = arith.constant 128 : index
    %c0_9 = arith.constant 0 : index
    %14 = vector.load %arg3[%c0_8, %c128, %c0_9] : memref<1x384x128xbf16, #tpu.memory_space<vmem>>, vector<1x128x128xbf16>
    %15 = vector.shape_cast %14 : vector<1x128x128xbf16> to vector<128x128xbf16>
    %cst_10 = arith.constant dense<0.000000e+00> : vector<16x128xf32>
    %16 = tpu.matmul %13, %15, %cst_10 {dimension_numbers = #tpu.dot_dimension_numbers<[1], [0], [0], [1], [0, 0, 1, 1], [], []>} : vector<16x128xbf16>, vector<128x128xbf16>, vector<16x128xf32> -> vector<16x128xf32>
    %17 = vector.extract_strided_slice %2 {offsets = [1, 0], sizes = [1, 128], strides = [1, 1]} : vector<3x128xf32> to vector<1x128xf32>
    %18 = vector.shape_cast %17 : vector<1x128xf32> to vector<128xf32>
    %19 = vector.shape_cast %18 : vector<128xf32> to vector<1x128xf32>
    %20 = vector.broadcast %19 : vector<1x128xf32> to vector<16x128xf32>
    %21 = arith.addf %16, %20 : vector<16x128xf32>
    %cst_11 = arith.constant 0.000000e+00 : f32
    %22 = vector.broadcast %cst_11 : f32 to vector<16x128xf32>
    %23 = arith.maximumf %21, %22 : vector<16x128xf32>
    %24 = arith.truncf %23 : vector<16x128xf32> to vector<16x128xbf16>
    %c0_12 = arith.constant 0 : index
    %c256 = arith.constant 256 : index
    %c0_13 = arith.constant 0 : index
    %25 = vector.load %arg3[%c0_12, %c256, %c0_13] : memref<1x384x128xbf16, #tpu.memory_space<vmem>>, vector<1x128x128xbf16>
    %26 = vector.shape_cast %25 : vector<1x128x128xbf16> to vector<128x128xbf16>
    %cst_14 = arith.constant dense<0.000000e+00> : vector<16x128xf32>
    %27 = tpu.matmul %24, %26, %cst_14 {dimension_numbers = #tpu.dot_dimension_numbers<[1], [0], [0], [1], [0, 0, 1, 1], [], []>} : vector<16x128xbf16>, vector<128x128xbf16>, vector<16x128xf32> -> vector<16x128xf32>
    %28 = vector.extract_strided_slice %2 {offsets = [2, 0], sizes = [1, 128], strides = [1, 1]} : vector<3x128xf32> to vector<1x128xf32>
    %29 = vector.shape_cast %28 : vector<1x128xf32> to vector<128xf32>
    %30 = vector.shape_cast %29 : vector<128xf32> to vector<1x128xf32>
    %31 = vector.broadcast %30 : vector<1x128xf32> to vector<16x128xf32>
    %32 = arith.addf %27, %31 : vector<16x128xf32>
    %c0_15 = arith.constant 0 : index
    %c0_16 = arith.constant 0 : index
    %33 = vector.load %arg6[%c0_15, %c0_16] : memref<16x128xf32, #tpu.memory_space<vmem>>, vector<16x128xf32>
    tpu.vector_store %arg6[%c0_15, %c0_16], %32 {strides = array<i32>} : memref<16x128xf32, #tpu.memory_space<vmem>>, vector<16x128xf32>,
    %c0_17 = arith.constant 0 : index
    %c0_18 = arith.constant 0 : index
    %34 = vector.load %arg5[%c0_17, %c0_18] : memref<16x1xi32, #tpu.memory_space<vmem>>, vector<16x1xi32>
    %35 = tpu.iota {dimensions = array<i32: 1>} : vector<16x128xi32>
    %36 = vector.broadcast %34 : vector<16x1xi32> to vector<16x128xi32>
    %37 = arith.cmpi eq, %35, %36 : vector<16x128xi32>
    %cst_19 = arith.constant 0.000000e+00 : f32
    %38 = vector.broadcast %cst_19 : f32 to vector<16x128xf32>
    %39 = arith.select %37, %32, %38 : vector<16x128xi1>, vector<16x128xf32>
    %cst_20 = arith.constant dense<0.000000e+00> : vector<16xf32>
    %40 = vector.multi_reduction <add>, %39, %cst_20 [1] : vector<16x128xf32> to vector<16xf32>
    %41 = vector.shape_cast %40 : vector<16xf32> to vector<16x1xf32>
    %c0_21 = arith.constant 0 : index
    %c0_22 = arith.constant 0 : index
    %42 = vector.load %arg7[%c0_21, %c0_22] : memref<16x1xf32, #tpu.memory_space<vmem>>, vector<16x1xf32>
    tpu.vector_store %arg7[%c0_21, %c0_22], %41 {strides = array<i32>} : memref<16x1xf32, #tpu.memory_space<vmem>>, vector<16x1xf32>,
    return
  }
  func.func @transform_0(%arg0: i32, %arg1: memref<1xi32, #tpu.memory_space<smem>>) -> (i32, i32) {
    %c0_i32 = arith.constant 0 : i32
    %c0_i32_0 = arith.constant 0 : i32
    return %arg0, %c0_i32 : i32, i32
  }
  func.func @transform_1(%arg0: i32, %arg1: memref<1xi32, #tpu.memory_space<smem>>) -> (i32, i32, i32) {
    %c0 = arith.constant 0 : index
    %0 = memref.load %arg1[%c0] : memref<1xi32, #tpu.memory_space<smem>>
    %c0_i32 = arith.constant 0 : i32
    %c0_i32_0 = arith.constant 0 : i32
    %c0_i32_1 = arith.constant 0 : i32
    return %0, %c0_i32, %c0_i32_0 : i32, i32, i32
  }
  func.func @transform_2(%arg0: i32, %arg1: memref<1xi32, #tpu.memory_space<smem>>) -> (i32, i32, i32) {
    %c0 = arith.constant 0 : index
    %0 = memref.load %arg1[%c0] : memref<1xi32, #tpu.memory_space<smem>>
    %c0_i32 = arith.constant 0 : i32
    %c0_i32_0 = arith.constant 0 : i32
    %c0_i32_1 = arith.constant 0 : i32
    return %0, %c0_i32, %c0_i32_0 : i32, i32, i32
  }
  func.func @transform_3(%arg0: i32, %arg1: memref<1xi32, #tpu.memory_space<smem>>) -> (i32, i32) {
    %c0_i32 = arith.constant 0 : i32
    %c0_i32_0 = arith.constant 0 : i32
    return %arg0, %c0_i32 : i32, i32
  }
  func.func @transform_4(%arg0: i32, %arg1: memref<1xi32, #tpu.memory_space<smem>>) -> (i32, i32) {
    %c0_i32 = arith.constant 0 : i32
    %c0_i32_0 = arith.constant 0 : i32
    return %arg0, %c0_i32 : i32, i32
  }
  func.func @transform_5(%arg0: i32, %arg1: memref<1xi32, #tpu.memory_space<smem>>) -> (i32, i32) {
    %c0_i32 = arith.constant 0 : i32
    %c0_i32_0 = arith.constant 0 : i32
    return %arg0, %c0_i32 : i32, i32
  }
}

</mosaic_0001>

<bundles_post_ra>
// kernel: _nstep_forward.1
= control target key start
LH: loop header
LB: loop body
LE: loop exit
PB: predicated region body
PF: predicated region fallthrough
CT: control target
= control target key end

     0   :  { %13 = vsyncpa [#allocation5], 0  ;;  %s613_s24 = smov [#allocation4]   ;;  %s726_s0 = inlined_call_operand.<no memory space> [shape: s32[1], index: 0, kind: input, shape index: {}]   ;;  %s727_s1 = inlined_call_operand.vmem [shape: bf16[16,128], index: 1, kind: input, shape index: {}]   ;;  %s728_s2 = inlined_call_operand.hbm [shape: bf16[2,384,128], index: 2, kind: input, shape index: {}]   ;;  %s729_s3 = inlined_call_operand.vmem [shape: f32[2,3,128], index: 3, kind: input, shape index: {}]   ;;  %s730_s4 = inlined_call_operand.vmem [shape: s32[16,1], index: 4, kind: input, shape index: {}]   ;;  %s731_s5 = inlined_call_operand.vmem [shape: f32[16,128], index: 5, kind: output, shape index: {0}]   ;;  %s732_s6 = inlined_call_operand.vmem [shape: f32[16,1], index: 6, kind: output, shape index: {1}]  }
   0x1   :  { %s554_s23 = smul.u32 3072, %s726_s0  ;;  %s25_s25 = sshll.u32 %s613_s24, 4  ;;  %s26_s25 = int_to_ptr.vmem [resolvable:$true] %s25_s25 }
   0x2   :  { %s589_s8 = scalar_lea.hbm %s728_s2, 6144 }
   0x3   :  { %s24_s28 = scalar_lea.hbm %s728_s2, %s554_s23 }
   0x4   :  { %s587_s29 = scalar_lea.hbm %s24_s28, 3072  ;;  %p590_p1 = scmp.lt.u32.totalorder %s24_s28, %s728_s2 }
   0x5   :  { %p588_p0 = scmp.ne.s32.totalorder %s24_s28, %s587_s29  ;;  %p591_p2 = scmp.lt.u32.totalorder %s589_s8, %s587_s29 }
   0x6   :  { %p593_p4 = scmp.lt.u32.totalorder %s587_s29, %s24_s28 }
   0x7   :  { %p592_p3 = por %p591_p2, %p590_p1 }
   0x9   :  { %p594_p5 = por %p593_p4, %p592_p3 }
   0xb   :  { %p595_p6 = pnand %p594_p5, %p588_p0 }
   0xd   :  { %598 = shalt.err (!%p595_p6)
}
   0xe   :  { %s599_s11 = scalar_lea.vmem %s26_s25, 3072  ;;  %p604_p8 = scmp.lt.s32.totalorder %s26_s25, %s26_s25 }
   0xf   :  { %p600_p7 = scmp.ne.s32.totalorder %s26_s25, %s599_s11  ;;  %p605_p9 = scmp.lt.s32.totalorder %s599_s11, %s599_s11 }
  0x11   :  { %p606_p10 = por %p605_p9, %p604_p8 }
  0x13   :  { %p607_p11 = pnand %p606_p10, %p600_p7 }
  0x15   :  { %610 = shalt.err (!%p607_p11)
}
  0x16   :  { %s614_s12 = smov 64   ;;  %s615_s13 = smov 4  }
  0x17   :  { %31 = dma.hbm_to_vmem [thread:$0]  %s24_s28, 3072, %s26_s25, [#allocation5], %s614_s12, %s614_s12, %s615_s13  }
  0x18   :  { %611 = dma.done.wait [#allocation5], 3072  }
  0x19   :  { %612 = vsyncadd [#allocation5], 4294964224  ;;  %v616_v0 = vmov 0.0   ;;  %vm617_vm0 = vmmov 0   ;;  %v562_v1 = vld [vmem:[#allocation4] sm:$0xff]   ;;  %v563_v2 = vld [vmem:[#allocation4 + $0x8] sm:$0xff]   ;;  %v77_v24 = vlaneseq }
  0x1a   :  { %494 = vmatprep.subr.bf16.mxu0 %v616_v0  ;;  %510 = vmatprep.mubr.msk.bf16.mxu0 %vm617_vm0, %v616_v0  ;;  %v564_v3 = vld [vmem:[#allocation4 + $0x10] sm:$0xff]   ;;  %v571_v4 = vld [vmem:[#allocation4 + $0x40] sm:$0xff]   ;;  %v565_v5 = vld [vmem:[#allocation4 + $0x18] sm:$0xff]   ;;  %p52_p12 = scmp.lt.s32.totalorder %s726_s0, 1  ;;  %v618_v41 = vmov 0   ;;  %vm420_vm3 = vcmask 7168  }
  0x1b   :  { %514 = vmatprep.subr.bf16.mxu1 %v616_v0  ;;  %530 = vmatprep.mubr.msk.bf16.mxu1 %vm617_vm0, %v616_v0  ;;  %v572_v6 = vld [vmem:[#allocation4 + $0x48] sm:$0xff]   ;;  %v566_v7 = vld [vmem:[#allocation4 + $0x20] sm:$0xff]   ;;  %v573_v8 = vld [vmem:[#allocation4 + $0x50] sm:$0xff]   ;;  %v78_v25 = vshrl.u32 %v77_v24, 7  ;;  %v405_v55 = vand.u32 127, %v77_v24 }
  0x1c   :  { %495 = vmatpush3.bf16.msra.mxu0 %v562_v1  ;;  %515 = vmatpush3.bf16.msra.mxu1 %v571_v4  ;;  %v567_v9 = vld [vmem:[#allocation4 + $0x28] sm:$0xff]   ;;  %v574_v10 = vld [vmem:[#allocation4 + $0x58] sm:$0xff]   ;;  %v568_v11 = vld [vmem:[#allocation4 + $0x30] sm:$0xff]   ;;  %s734_s0 = smov (!%p52_p12, %s726_s0), 1 }
  0x1d   :  { %496 = vmatprep.subr.bf16.mxu0 %v616_v0  ;;  %516 = vmatprep.subr.bf16.mxu1 %v616_v0  ;;  %v575_v12 = vld [vmem:[#allocation4 + $0x60] sm:$0xff]   ;;  %v569_v13 = vld [vmem:[#allocation4 + $0x38] sm:$0xff]   ;;  %v576_v14 = vld [vmem:[#allocation4 + $0x68] sm:$0xff]   ;;  %s441_s18 = sshll.u32 %s734_s0, 2  ;;  %v79_v26 = vsub.s32 0, %v78_v25  ;;  %v197_v43 = vsub.s32 1, %v78_v25 }
  0x1e   :  { %v570_v15 = vld [vmem:[%s727_s1] sm:$0xff]   ;;  %v577_v16 = vld [vmem:[#allocation4 + $0x70] sm:$0xff]   ;;  %v578_v17 = vld [vmem:[#allocation4 + $0x78] sm:$0xff]   ;;  %s55_s21 = scalar_lea.vmem %s729_s3, %s441_s18  ;;  %561 = vset.pattern.permute.xlu0 %v618_v41  ;;  %v309_v54 = vsub.s32 2, %v78_v25 }
  0x1f   :  { %v579_v18 = vld [vmem:[#allocation4 + $0x80] sm:$0xff]   ;;  %v580_v19 = vld [vmem:[#allocation4 + $0x88] sm:$0xff]   ;;  %v581_v20 = vld [vmem:[#allocation4 + $0x90] sm:$0xff]  }
  0x20   :  { %497 = vmatpush3.bf16.msra.mxu0 %v563_v2  ;;  %517 = vmatpush3.bf16.msra.mxu1 %v572_v6  ;;  %v582_v21 = vld [vmem:[#allocation4 + $0x98] sm:$0xff]   ;;  %v583_v22 = vld [vmem:[#allocation4 + $0xa0] sm:$0xff]   ;;  %v584_v23 = vld [vmem:[#allocation4 + $0xa8] sm:$0xff]  }
  0x21   :  { %498 = vmatprep.subr.bf16.mxu0 %v616_v0  ;;  %518 = vmatprep.subr.bf16.mxu1 %v616_v0  ;;  %v60_v27 = vld [vmem:[%s55_s21] sm:$0x7]  ;;  %v585_v38 = vld [vmem:[#allocation4 + $0xb0] sm:$0xff]   ;;  %v586_v39 = vld [vmem:[#allocation4 + $0xb8] sm:$0xff]  }
  0x22   :  { %v80_v28 = vrot.slane %v60_v27, %v79_v26  ;;  %v402_v40 = vld [vmem:[%s730_s4] sm:$0xff]  ;;  %v403_v42 = vld [vmem:[%s730_s4 + $0x8] sm:$0xff]  ;;  %v198_v44 = vrot.slane %v60_v27, %v197_v43  ;;  %v310_v57 = vrot.slane %v60_v27, %v309_v54 }
  0x23   :  { %407 = vperm.xlu0 %561, %v402_v40  }
  0x24   :  { %499 = vmatpush3.bf16.msra.mxu0 %v564_v3  ;;  %519 = vmatpush3.bf16.msra.mxu1 %v573_v8 }
  0x25   :  { %500 = vmatprep.subr.bf16.mxu0 %v616_v0  ;;  %520 = vmatprep.subr.bf16.mxu1 %v616_v0 }
  0x27   :  { %410 = vperm.xlu0 %561, %v403_v42  }
  0x28   :  { %501 = vmatpush3.bf16.msra.mxu0 %v565_v5  ;;  %521 = vmatpush3.bf16.msra.mxu1 %v574_v10 }
  0x29   :  { %502 = vmatprep.subr.bf16.mxu0 %v616_v0  ;;  %522 = vmatprep.subr.bf16.mxu1 %v616_v0 }
  0x2c   :  { %503 = vmatpush3.bf16.msra.mxu0 %v566_v7  ;;  %523 = vmatpush3.bf16.msra.mxu1 %v575_v12 }
  0x2d   :  { %504 = vmatprep.subr.bf16.mxu0 %v616_v0  ;;  %524 = vmatprep.subr.bf16.mxu1 %v616_v0 }
  0x30   :  { %505 = vmatpush3.bf16.msra.mxu0 %v567_v9  ;;  %525 = vmatpush3.bf16.msra.mxu1 %v576_v14 }
  0x31   :  { %506 = vmatprep.subr.bf16.mxu0 %v616_v0  ;;  %526 = vmatprep.subr.bf16.mxu1 %v616_v0 }
  0x34   :  { %507 = vmatpush3.bf16.msra.mxu0 %v568_v11  ;;  %527 = vmatpush3.bf16.msra.mxu1 %v577_v16 }
  0x35   :  { %508 = vmatprep.subr.bf16.mxu0 %v616_v0  ;;  %528 = vmatprep.subr.bf16.mxu1 %v616_v0 }
  0x38   :  { %509 = vmatpush3.bf16.msra.mxu0 %v569_v13  ;;  %529 = vmatpush3.bf16.msra.mxu1 %v578_v17 }
  0x39   :  { %534 = vmatprep.subr.bf16.mxu0 %v616_v0 }
  0x3b   :  { %511 = vmatmul.mubr.bf16.vlgmr.msra.gmra.mrb[0].mxu0 %v570_v15 }
  0x3c   :  { %550 = vmatprep.mubr.msk.bf16.mxu0 %vm617_vm0, %v616_v0  ;;  %535 = vmatpush3.bf16.msra.mxu0 %v579_v18 }
  0x3d   :  { %536 = vmatprep.subr.bf16.mxu0 %v616_v0 }
  0x40   :  { %537 = vmatpush3.bf16.msra.mxu0 %v580_v19 }
  0x41   :  { %538 = vmatprep.subr.bf16.mxu0 %v616_v0 }
  0x44   :  { %539 = vmatpush3.bf16.msra.mxu0 %v581_v20 }
  0x45   :  { %540 = vmatprep.subr.bf16.mxu0 %v616_v0 }
  0x48   :  { %541 = vmatpush3.bf16.msra.mxu0 %v582_v21 }
  0x49   :  { %542 = vmatprep.subr.bf16.mxu0 %v616_v0 }
  0x4c   :  { %543 = vmatpush3.bf16.msra.mxu0 %v583_v22 }
  0x4d   :  { %544 = vmatprep.subr.bf16.mxu0 %v616_v0 }
  0x50   :  { %545 = vmatpush3.bf16.msra.mxu0 %v584_v23 }
  0x51   :  { %546 = vmatprep.subr.bf16.mxu0 %v616_v0 }
  0x54   :  { %547 = vmatpush3.bf16.msra.mxu0 %v585_v38 }
  0x55   :  { %548 = vmatprep.subr.bf16.mxu0 %v616_v0 }
  0x58   :  { %549 = vmatpush3.bf16.msra.mxu0 %v586_v39 }
  0xa2   :  { %v408_v56 = vpop.permute.xlu0 %407 }
  0xa3   :  { %vm412_vm1 = vcmp.eq.s32.totalorder %v405_v55, %v408_v56 }
  0xa6   :  { %v411_v62 = vpop.permute.xlu0 %410 }
  0xa7   :  { %vm413_vm2 = vcmp.eq.s32.totalorder %v405_v55, %v411_v62 }
 0x10e   :  { %v169_v29 = vpop.f32.mrb[0].mxu0 }
 0x10f   :  { %v170_v30 = vadd.f32 %v169_v29, %v80_v28  ;;  %v512_v31 = vpop.f32.mrb[1].mxu0 }
 0x110   :  { %v172_v32 = vpop.f32.mrb[2].mxu0 }
 0x111   :  { %v173_v33 = vadd.f32 %v172_v32, %v80_v28  ;;  %v513_v34 = vpop.f32.mrb[3].mxu0  ;;  %v176_v35 = vmax.f32 %v170_v30, 0.0 }
 0x113   :  { %v177_v36 = vmax.f32 %v173_v33, 0.0 }
 0x115   :  { %v178_v37 = vpack.c.bf16 %v177_v36, %v176_v35 }
 0x117   :  { %531 = vmatmul.mubr.bf16.vlgmr.msra.gmra.mrb[0].mxu1 %v178_v37 }
 0x1ea   :  { %v281_v45 = vpop.f32.mrb[0].mxu1 }
 0x1eb   :  { %v282_v46 = vadd.f32 %v281_v45, %v198_v44  ;;  %v532_v47 = vpop.f32.mrb[1].mxu1 }
 0x1ec   :  { %v284_v48 = vpop.f32.mrb[2].mxu1 }
 0x1ed   :  { %v285_v49 = vadd.f32 %v284_v48, %v198_v44  ;;  %v533_v50 = vpop.f32.mrb[3].mxu1  ;;  %v288_v51 = vmax.f32 %v282_v46, 0.0 }
 0x1ef   :  { %v289_v52 = vmax.f32 %v285_v49, 0.0 }
 0x1f1   :  { %v290_v53 = vpack.c.bf16 %v289_v52, %v288_v51 }
 0x1f3   :  { %551 = vmatmul.mubr.bf16.vlgmr.msra.gmra.mrb[4].mxu0 %v290_v53 }
 0x2c6   :  { %v393_v58 = vpop.f32.mrb[4].mxu0 }
 0x2c7   :  { %v394_v59 = vadd.f32 %v393_v58, %v310_v57  ;;  %v552_v60 = vpop.f32.mrb[5].mxu0 }
 0x2c8   :  { %v396_v61 = vpop.f32.mrb[6].mxu0 }
 0x2c9   :  { %400 = vst [vmem:[%s731_s5] sm:$0xff] %v394_v59  ;;  %v397_v63 = vadd.f32 %v396_v61, %v310_v57  ;;  %v553_v0 = vpop.f32.mrb[7].mxu0  ;;  %v414_v1 = vsel %vm412_vm1, %v394_v59, 0.0 }
 0x2ca   :  { %416 = vadd.xlane.f32.xlu1 %v414_v1 }
 0x2cb   :  { %401 = vst [vmem:[%s731_s5 + $0x8] sm:$0xff] %v397_v63  ;;  %v415_v2 = vsel %vm413_vm2, %v397_v63, 0.0 }
 0x2ce   :  { %418 = vadd.xlane.f32.xlu1 %v415_v2 }
 0x357   :  { %v417_v3 = vpop.xlane.xlu1 %416 }
 0x358   :  { %421 = vst.msk [vmem:[%s732_s6] sm:$0xff] %vm420_vm3, %v417_v3 }
 0x35b   :  { %v419_v4 = vpop.xlane.xlu1 %418 }
 0x35c   :  { %422 = vst.msk [vmem:[%s732_s6 + $0x8] sm:$0xff] %vm420_vm3, %v419_v4 }
 0x35d   :  { %431 = vsyncpa [#allocation5], 1 }

</bundles_post_ra>
